<compile_context>
chip_gen: v5e
topology: v5e:2x2
jax: 0.10.0
libtpu: 0.0.40
codegen_flags: <defaults>
</compile_context>

<pallas_src>
import functools

import jax
import jax.numpy as jnp
from jax import lax
from jax.experimental import pallas as pl
from jax.experimental.pallas import tpu as pltpu


def _round_up(x, m):
    return ((x + m - 1) // m) * m


def lstm_tagger_kernel(ids_ref,   # VMEM (S*TB, 1) int32, time-major token ids for this batch block
                       emb_ref,   # VMEM (V, E)    embedding table
                       wih_ref,   # VMEM (E, 4G)   fused W_ih, gates [i,f,o,g], each gate [fwd H | bwd H | 0-pad]
                       whh_ref,   # VMEM (G, 4G)   fused block-diagonal W_hh (never read when S == 1: h0 == 0)
                       b_ref,     # VMEM (1, 4G)   fused bias (b_ih + b_hh, both directions)
                       w2s_ref,   # VMEM (S*G, T)  hidden2tag, step-t rows pre-paired [w2_fwd(t) | w2_bwd(S-1-t) | 0]
                       b2_ref,    # VMEM (1, T)
                       out_ref,   # VMEM (TB, T)   log-probabilities
                       *, hidden_size, seq_len):
    H = hidden_size
    S = seq_len
    TB = out_ref.shape[0]
    V = emb_ref.shape[0]
    G4 = wih_ref.shape[1]
    G = G4 // 4                                   # lane-aligned gate-block width (multiple of 128)

    # ---- 1) Embedding gather as a one-hot MXU matmul (table stays resident in VMEM) ----
    ids = ids_ref[...]                                                           # (S*TB, 1)
    onehot = (ids == lax.broadcasted_iota(jnp.int32, (S * TB, V), 1)).astype(jnp.float32)
    x = jnp.dot(onehot, emb_ref[...], preferred_element_type=jnp.float32)        # (S*TB, E)

    # ---- 2) Input projection for all timesteps & both directions in one matmul ----
    xg_all = jnp.dot(x, wih_ref[...], preferred_element_type=jnp.float32) + b_ref[...]   # (S*TB, 4G)

    # ---- 3) Hoisted fwd/bwd pairing: step t reads x(t) on forward lanes, x(S-1-t) on backward lanes ----
    if S == 1:
        xg_steps = [xg_all]                        # both directions read the same (only) timestep
    else:
        lane = lax.broadcasted_iota(jnp.int32, (1, G4), 1)
        fwd_mask = jnp.zeros((1, G4), jnp.bool_)   # lanes [q*G, q*G+H) of every gate block
        for q in range(4):
            fwd_mask = jnp.logical_or(
                fwd_mask, jnp.logical_and(lane >= q * G, lane < q * G + H))
        xg_steps = [
            jnp.where(fwd_mask,
                      xg_all[t * TB:(t + 1) * TB, :],
                      xg_all[(S - 1 - t) * TB:(S - t) * TB, :])
            for t in range(S)
        ]

    # ---- 4) Fused bidirectional recurrence, fully unrolled, h/c carried as vreg values ----
    h = None
    c = None
    hs = []
    for t in range(S):
        gates = xg_steps[t]
        if t > 0:                                  # t == 0: h0 == 0 so the W_hh term is identically zero
            gates = gates + jnp.dot(h, whh_ref[...], preferred_element_type=jnp.float32)
        sg = jax.nn.sigmoid(gates[:, :3 * G])      # [i | f | o] in one contiguous, lane-aligned slice
        gg = jnp.tanh(gates[:, 3 * G:])            # [g] only
        i_g = sg[:, 0:G]
        f_g = sg[:, G:2 * G]
        o_g = sg[:, 2 * G:3 * G]
        c = i_g * gg if t == 0 else f_g * c + i_g * gg    # (TB, G): fwd lanes 0:H, bwd lanes H:2H, pad 0
        h = o_g * jnp.tanh(c)
        hs.append(h)                               # stash; hidden2tag is done after the loop

    # ---- 5) hidden2tag, off the recurrence's carried dependency ----
    tag = b2_ref[...] + jnp.dot(hs[0], w2s_ref[0:G, :], preferred_element_type=jnp.float32)
    for t in range(1, S):
        tag = tag + jnp.dot(hs[t], w2s_ref[t * G:(t + 1) * G, :],
                            preferred_element_type=jnp.float32)

    # ---- 6) log_softmax(dim=1), numerically stabilized ----
    m = jnp.max(tag, axis=1, keepdims=True)
    shifted = tag - m
    lse = jnp.log(jnp.sum(jnp.exp(shifted), axis=1, keepdims=True))
    out_ref[...] = shifted - lse


def lstm_tagger_forward(sentences, params, *, batch_block=8):
    """LSTMTagger.forward for a batch of sentences.

    sentences: (B, S) int32 token ids.  Row b of the (B, tagset_size) result equals the
    module's (1, tagset_size) output for sentence b.  The PyTorch module's
    `lstm_out.view(1, -1)` + Linear(hidden_dim*2, tagset_size) only type-checks for
    S == 1; the kernel's recurrence is general and accepts any S for which params["w2"]
    has S*2H input columns.
    """
    B, S = sentences.shape
    V, E = params["emb"].shape
    H = params["w_hh_f"].shape[1]
    T = params["w2"].shape[0]
    assert params["w2"].shape[1] == S * 2 * H, (
        "hidden2tag expects S*2H input features (the nn.Module itself forces S == 1)")

    G = _round_up(2 * H, 128)                      # lane-aligned gate-block width
    TB = B if B < batch_block else batch_block
    assert B % TB == 0, "batch must divide into batch blocks"
    nb = B // TB

    # --- fuse weights into the kernel layout (kernel gate order [i,f,o,g]; PyTorch is [i,f,g,o]) ---
    def fuse_cols(a_f, a_b):
        # a_* : (rows, 4H), PyTorch gate column blocks [i, f, g, o]
        # -> (rows, 4G), kernel gates [i, f, o, g], each block [fwd H | bwd H | zero pad]
        rows = a_f.shape[0]
        out = jnp.zeros((rows, 4 * G), jnp.float32)
        for q, p in enumerate((0, 1, 3, 2)):       # kernel gate q  <-  PyTorch gate block p
            out = out.at[:, q * G:q * G + H].set(a_f[:, p * H:(p + 1) * H])
            out = out.at[:, q * G + H:q * G + 2 * H].set(a_b[:, p * H:(p + 1) * H])
        return out

    wih = fuse_cols(params["w_ih_f"].T, params["w_ih_b"].T)                       # (E, 4G)

    zeros_h = jnp.zeros((H, 4 * H), jnp.float32)
    whh = jnp.concatenate([fuse_cols(params["w_hh_f"].T, zeros_h),                # fwd-h rows
                           fuse_cols(zeros_h, params["w_hh_b"].T),                # bwd-h rows
                           jnp.zeros((G - 2 * H, 4 * G), jnp.float32)], axis=0)   # pad rows -> (G, 4G)

    b = fuse_cols((params["b_ih_f"] + params["b_hh_f"]).reshape(1, 4 * H),
                  (params["b_ih_b"] + params["b_hh_b"]).reshape(1, 4 * H))        # (1, 4G)

    # hidden2tag: step t contracts against [w2 rows for fwd hidden at t | w2 rows for bwd hidden
    # at S-1-t | zero pad]  (the kernel's backward lanes at step t hold PyTorch's h_bwd(S-1-t)).
    w2t = params["w2"].T.reshape(S, 2 * H, T)
    w2s = jnp.concatenate([w2t[:, :H, :], w2t[::-1, H:, :],
                           jnp.zeros((S, G - 2 * H, T), jnp.float32)],
                          axis=1).reshape(S * G, T)
    b2 = params["b2"].reshape(1, T).astype(jnp.float32)

    # --- token ids, time-major within each batch block: row t*TB + b  <->  (sentence b, position t) ---
    ids_tm = (sentences.astype(jnp.int32)
              .reshape(nb, TB, S).transpose(0, 2, 1).reshape(nb * S * TB, 1))

    kernel = functools.partial(lstm_tagger_kernel, hidden_size=H, seq_len=S)

    return pl.pallas_call(
        kernel,
        out_shape=jax.ShapeDtypeStruct((B, T), jnp.float32),
        grid=(nb,),
        in_specs=[
            pl.BlockSpec((S * TB, 1), lambda i: (i, 0)),     # ids (per batch block)
            pl.BlockSpec((V, E), lambda i: (0, 0)),          # embedding table (VMEM resident)
            pl.BlockSpec((E, 4 * G), lambda i: (0, 0)),      # fused W_ih
            pl.BlockSpec((G, 4 * G), lambda i: (0, 0)),      # fused W_hh
            pl.BlockSpec((1, 4 * G), lambda i: (0, 0)),      # fused bias
            pl.BlockSpec((S * G, T), lambda i: (0, 0)),      # fused hidden2tag weight
            pl.BlockSpec((1, T), lambda i: (0, 0)),          # hidden2tag bias
        ],
        out_specs=pl.BlockSpec((TB, T), lambda i: (i, 0)),
        compiler_params=pltpu.CompilerParams(
            dimension_semantics=("parallel",)),              # batch blocks shard across TCs on v7x
    )(ids_tm, params["emb"].astype(jnp.float32), wih, whh, b, w2s, b2)


def init_params(key, vocab_size, embedding_dim, hidden_dim, tagset_size, seq_len=1):
    E, H, V, T = embedding_dim, hidden_dim, vocab_size, tagset_size
    ks = jax.random.split(key, 11)
    bound = 1.0 / (H ** 0.5)

    def u(k, shape):
        return jax.random.uniform(k, shape, jnp.float32, -bound, bound)

    return {
        "emb": jax.random.normal(ks[0], (V, E), jnp.float32),          # nn.Embedding weight
        # nn.LSTM (bidirectional): weight_ih (4H, E), weight_hh (4H, H), PyTorch gate order i,f,g,o
        "w_ih_f": u(ks[1], (4 * H, E)), "w_hh_f": u(ks[2], (4 * H, H)),
        "b_ih_f": u(ks[3], (4 * H,)),   "b_hh_f": u(ks[4], (4 * H,)),
        "w_ih_b": u(ks[5], (4 * H, E)), "w_hh_b": u(ks[6], (4 * H, H)),
        "b_ih_b": u(ks[7], (4 * H,)),   "b_hh_b": u(ks[8], (4 * H,)),
        # nn.Linear(hidden_dim*2, tagset_size); the forward flattens lstm_out to (1, S*2H),
        # so seq_len != 1 needs a correspondingly wider weight.
        "w2": u(ks[9], (T, seq_len * 2 * H)), "b2": u(ks[10], (T,)),
    }


def reference_forward(sentences, params):
    """Pure-JAX reference matching PyTorch semantics per sentence (vmapped over the batch)."""
    H = params["w_hh_f"].shape[1]

    def run_dir(xs, w_ih, w_hh, b_ih, b_hh):
        def step(carry, x):
            h, c = carry
            g = x @ w_ih.T + b_ih + h @ w_hh.T + b_hh
            i = jax.nn.sigmoid(g[0:H])
            f = jax.nn.sigmoid(g[H:2 * H])
            gg = jnp.tanh(g[2 * H:3 * H])
            o = jax.nn.sigmoid(g[3 * H:4 * H])
            c = f * c + i * gg
            h = o * jnp.tanh(c)
            return (h, c), h
        init = (jnp.zeros((H,), jnp.float32), jnp.zeros((H,), jnp.float32))
        _, hs = lax.scan(step, init, xs)
        return hs

    def one(sentence):
        emb = params["emb"][sentence]                              # (S, E)
        hf = run_dir(emb, params["w_ih_f"], params["w_hh_f"],
                     params["b_ih_f"], params["b_hh_f"])
        hb = run_dir(emb[::-1], params["w_ih_b"], params["w_hh_b"],
                     params["b_ih_b"], params["b_hh_b"])[::-1]
        lstm_out = jnp.concatenate([hf, hb], axis=-1)              # (S, 2H)
        tag_space = lstm_out.reshape(1, -1) @ params["w2"].T + params["b2"]
        return jax.nn.log_softmax(tag_space, axis=1)[0]

    return jax.vmap(one)(sentences)


if __name__ == "__main__":
    embedding_dim, hidden_dim, vocab_size, tagset_size = 32, 32, 48, 6

    key = jax.random.PRNGKey(0)
    k_params1, k_data1, k_params2, k_data2 = jax.random.split(key, 4)

    # --- Module-exact case: len(sentence) == 1 (forced by the module's view(1,-1) + Linear(2H,T)),
    #     batched over 16 independent sentences, grid=(2,) batch blocks run in parallel. ---
    batch, seq_len = 16, 1
    params = init_params(k_params1, vocab_size, embedding_dim, hidden_dim, tagset_size, seq_len)
    sentences = jax.random.randint(k_data1, (batch, seq_len), 0, vocab_size, dtype=jnp.int32)

    out = jax.block_until_ready(lstm_tagger_forward(sentences, params))
    ref = reference_forward(sentences, params)
    assert out.shape == (batch, tagset_size)
    assert jnp.allclose(out, ref, atol=1e-4, rtol=1e-4), (out, ref)

    # --- General-S check of the fused bidirectional recurrence (S = 4), against the same
    #     pure-JAX reference with a correspondingly wider hidden2tag weight. ---
    batch2, seq_len2 = 16, 4
    params2 = init_params(k_params2, vocab_size, embedding_dim, hidden_dim, tagset_size, seq_len2)
    sentences2 = jax.random.randint(k_data2, (batch2, seq_len2), 0, vocab_size, dtype=jnp.int32)

    out2 = jax.block_until_ready(lstm_tagger_forward(sentences2, params2))
    ref2 = reference_forward(sentences2, params2)
    assert jnp.allclose(out2, ref2, atol=1e-4, rtol=1e-4), (out2, ref2)

    print("KERNEL_OK")
</pallas_src>

<mosaic_0001>
module attributes {stable_mosaic.version = 11 : i64} {
  func.func @lstm_tagger_kernel(%arg0: i32, %arg1: memref<8x1xi32, #tpu.memory_space<vmem>>, %arg2: memref<48x32xf32, #tpu.memory_space<vmem>>, %arg3: memref<32x512xf32, #tpu.memory_space<vmem>>, %arg4: memref<128x512xf32, #tpu.memory_space<vmem>>, %arg5: memref<1x512xf32, #tpu.memory_space<vmem>>, %arg6: memref<128x6xf32, #tpu.memory_space<vmem>>, %arg7: memref<1x6xf32, #tpu.memory_space<vmem>>, %arg8: memref<8x6xf32, #tpu.memory_space<vmem>>) attributes {dimension_semantics = [#tpu.dimension_semantics<parallel>], iteration_bounds = array<i64: 2>, scalar_prefetch = 0 : i64, scratch_operands = 0 : i64, tpu.core_type = #tpu.core_type<tc>, window_params = [{transform_indices = @transform_0, window_bounds = array<i64: 8, 1>}, {pipeline_mode = #tpu.pipeline_mode<synchronous>, transform_indices = @transform_1, window_bounds = array<i64: 48, 32>}, {pipeline_mode = #tpu.pipeline_mode<synchronous>, transform_indices = @transform_2, window_bounds = array<i64: 32, 512>}, {pipeline_mode = #tpu.pipeline_mode<synchronous>, transform_indices = @transform_3, window_bounds = array<i64: 128, 512>}, {pipeline_mode = #tpu.pipeline_mode<synchronous>, transform_indices = @transform_4, window_bounds = array<i64: 1, 512>}, {pipeline_mode = #tpu.pipeline_mode<synchronous>, transform_indices = @transform_5, window_bounds = array<i64: 128, 6>}, {pipeline_mode = #tpu.pipeline_mode<synchronous>, transform_indices = @transform_6, window_bounds = array<i64: 1, 6>}, {transform_indices = @transform_7, window_bounds = array<i64: 8, 6>}]} {
    %c0 = arith.constant 0 : index
    %c0_0 = arith.constant 0 : index
    %0 = vector.load %arg1[%c0, %c0_0] : memref<8x1xi32, #tpu.memory_space<vmem>>, vector<8x1xi32>
    %1 = tpu.iota {dimensions = array<i32: 1>} : vector<8x48xi32>
    %2 = vector.broadcast %0 : vector<8x1xi32> to vector<8x48xi32>
    %3 = arith.cmpi eq, %2, %1 : vector<8x48xi32>
    %4 = arith.extui %3 : vector<8x48xi1> to vector<8x48xi32>
    %5 = arith.sitofp %4 : vector<8x48xi32> to vector<8x48xf32>
    %c0_1 = arith.constant 0 : index
    %c0_2 = arith.constant 0 : index
    %6 = vector.load %arg2[%c0_1, %c0_2] : memref<48x32xf32, #tpu.memory_space<vmem>>, vector<48x32xf32>
    %cst = arith.constant dense<0.000000e+00> : vector<8x32xf32>
    %7 = tpu.matmul %5, %6, %cst {dimension_numbers = #tpu.dot_dimension_numbers<[1], [0], [0], [1], [0, 0, 1, 1], [], []>} : vector<8x48xf32>, vector<48x32xf32>, vector<8x32xf32> -> vector<8x32xf32>
    %c0_3 = arith.constant 0 : index
    %c0_4 = arith.constant 0 : index
    %8 = vector.load %arg3[%c0_3, %c0_4] : memref<32x512xf32, #tpu.memory_space<vmem>>, vector<32x512xf32>
    %cst_5 = arith.constant dense<0.000000e+00> : vector<8x512xf32>
    %9 = tpu.matmul %7, %8, %cst_5 {dimension_numbers = #tpu.dot_dimension_numbers<[1], [0], [0], [1], [0, 0, 1, 1], [], []>} : vector<8x32xf32>, vector<32x512xf32>, vector<8x512xf32> -> vector<8x512xf32>
    %c0_6 = arith.constant 0 : index
    %c0_7 = arith.constant 0 : index
    %10 = vector.load %arg5[%c0_6, %c0_7] : memref<1x512xf32, #tpu.memory_space<vmem>>, vector<1x512xf32>
    %11 = vector.broadcast %10 : vector<1x512xf32> to vector<8x512xf32>
    %12 = arith.addf %9, %11 : vector<8x512xf32>
    %13 = vector.extract_strided_slice %12 {offsets = [0, 0], sizes = [8, 384], strides = [1, 1]} : vector<8x512xf32> to vector<8x384xf32>
    %14 = arith.negf %13 : vector<8x384xf32>
    %15 = math.exp %14 : vector<8x384xf32>
    %cst_8 = arith.constant 1.000000e+00 : f32
    %16 = vector.broadcast %cst_8 : f32 to vector<8x384xf32>
    %17 = arith.addf %16, %15 : vector<8x384xf32>
    %18 = arith.divf %16, %17 : vector<8x384xf32>
    %19 = vector.extract_strided_slice %12 {offsets = [0, 384], sizes = [8, 128], strides = [1, 1]} : vector<8x512xf32> to vector<8x128xf32>
    %20 = math.tanh %19 : vector<8x128xf32>
    %21 = vector.extract_strided_slice %18 {offsets = [0, 0], sizes = [8, 128], strides = [1, 1]} : vector<8x384xf32> to vector<8x128xf32>
    %22 = vector.extract_strided_slice %18 {offsets = [0, 256], sizes = [8, 128], strides = [1, 1]} : vector<8x384xf32> to vector<8x128xf32>
    %23 = arith.mulf %21, %20 : vector<8x128xf32>
    %24 = math.tanh %23 : vector<8x128xf32>
    %25 = arith.mulf %22, %24 : vector<8x128xf32>
    %c0_9 = arith.constant 0 : index
    %c0_10 = arith.constant 0 : index
    %26 = vector.load %arg7[%c0_9, %c0_10] : memref<1x6xf32, #tpu.memory_space<vmem>>, vector<1x6xf32>
    %c0_11 = arith.constant 0 : index
    %c0_12 = arith.constant 0 : index
    %27 = vector.load %arg6[%c0_11, %c0_12] : memref<128x6xf32, #tpu.memory_space<vmem>>, vector<128x6xf32>
    %cst_13 = arith.constant dense<0.000000e+00> : vector<8x6xf32>
    %28 = tpu.matmul %25, %27, %cst_13 {dimension_numbers = #tpu.dot_dimension_numbers<[1], [0], [0], [1], [0, 0, 1, 1], [], []>} : vector<8x128xf32>, vector<128x6xf32>, vector<8x6xf32> -> vector<8x6xf32>
    %29 = vector.broadcast %26 : vector<1x6xf32> to vector<8x6xf32>
    %30 = arith.addf %29, %28 : vector<8x6xf32>
    %cst_14 = arith.constant dense<0xFF800000> : vector<8xf32>
    %31 = vector.multi_reduction <maximumf>, %30, %cst_14 [1] : vector<8x6xf32> to vector<8xf32>
    %32 = vector.shape_cast %31 : vector<8xf32> to vector<8x1xf32>
    %33 = vector.broadcast %32 : vector<8x1xf32> to vector<8x6xf32>
    %34 = arith.subf %30, %33 : vector<8x6xf32>
    %35 = math.exp %34 : vector<8x6xf32>
    %cst_15 = arith.constant dense<0.000000e+00> : vector<8xf32>
    %36 = vector.multi_reduction <add>, %35, %cst_15 [1] : vector<8x6xf32> to vector<8xf32>
    %37 = vector.shape_cast %36 : vector<8xf32> to vector<8x1xf32>
    %38 = math.log %37 : vector<8x1xf32>
    %39 = vector.broadcast %38 : vector<8x1xf32> to vector<8x6xf32>
    %40 = arith.subf %34, %39 : vector<8x6xf32>
    %c0_16 = arith.constant 0 : index
    %c0_17 = arith.constant 0 : index
    %41 = vector.load %arg8[%c0_16, %c0_17] : memref<8x6xf32, #tpu.memory_space<vmem>>, vector<8x6xf32>
    tpu.vector_store %arg8[%c0_16, %c0_17], %40 {strides = array<i32>} : memref<8x6xf32, #tpu.memory_space<vmem>>, vector<8x6xf32>,
    return
  }
  func.func @transform_0(%arg0: i32) -> (i32, i32) {
    %c0_i32 = arith.constant 0 : i32
    %c0_i32_0 = arith.constant 0 : i32
    return %arg0, %c0_i32 : i32, i32
  }
  func.func @transform_1(%arg0: i32) -> (i32, i32) {
    %c0_i32 = arith.constant 0 : i32
    %c0_i32_0 = arith.constant 0 : i32
    %c0_i32_1 = arith.constant 0 : i32
    return %c0_i32, %c0_i32_0 : i32, i32
  }
  func.func @transform_2(%arg0: i32) -> (i32, i32) {
    %c0_i32 = arith.constant 0 : i32
    %c0_i32_0 = arith.constant 0 : i32
    %c0_i32_1 = arith.constant 0 : i32
    return %c0_i32, %c0_i32_0 : i32, i32
  }
  func.func @transform_3(%arg0: i32) -> (i32, i32) {
    %c0_i32 = arith.constant 0 : i32
    %c0_i32_0 = arith.constant 0 : i32
    %c0_i32_1 = arith.constant 0 : i32
    return %c0_i32, %c0_i32_0 : i32, i32
  }
  func.func @transform_4(%arg0: i32) -> (i32, i32) {
    %c0_i32 = arith.constant 0 : i32
    %c0_i32_0 = arith.constant 0 : i32
    %c0_i32_1 = arith.constant 0 : i32
    return %c0_i32, %c0_i32_0 : i32, i32
  }
  func.func @transform_5(%arg0: i32) -> (i32, i32) {
    %c0_i32 = arith.constant 0 : i32
    %c0_i32_0 = arith.constant 0 : i32
    %c0_i32_1 = arith.constant 0 : i32
    return %c0_i32, %c0_i32_0 : i32, i32
  }
  func.func @transform_6(%arg0: i32) -> (i32, i32) {
    %c0_i32 = arith.constant 0 : i32
    %c0_i32_0 = arith.constant 0 : i32
    %c0_i32_1 = arith.constant 0 : i32
    return %c0_i32, %c0_i32_0 : i32, i32
  }
  func.func @transform_7(%arg0: i32) -> (i32, i32) {
    %c0_i32 = arith.constant 0 : i32
    %c0_i32_0 = arith.constant 0 : i32
    return %arg0, %c0_i32 : i32, i32
  }
}

</mosaic_0001>

<bundles_post_ra>
// kernel: tpu_custom_call.1
= control target key start
LH: loop header
LB: loop body
LE: loop exit
PB: predicated region body
PF: predicated region fallthrough
CT: control target
= control target key end

     0   :  { %12 = vsyncpa [#allocation3], 0  ;;  %s722_s24 = smov 0   ;;  %s860_s0 = inlined_call_operand.vmem [shape: s32[16,1], index: 0, kind: input, shape index: {}]   ;;  %s861_s1 = inlined_call_operand.vmem [shape: f32[48,32], index: 1, kind: input, shape index: {}]   ;;  %s862_s2 = inlined_call_operand.vmem [shape: f32[32,512], index: 2, kind: input, shape index: {}]   ;;  %s863_s3 = inlined_call_operand.hbm [shape: f32[128,512], index: 3, kind: input, shape index: {}]   ;;  %s864_s4 = inlined_call_operand.vmem [shape: f32[1,512], index: 4, kind: input, shape index: {}]   ;;  %s865_s5 = inlined_call_operand.vmem [shape: f32[128,6], index: 5, kind: input, shape index: {}]   ;;  %s866_s6 = inlined_call_operand.vmem [shape: f32[1,6], index: 6, kind: input, shape index: {}]   ;;  %s867_s7 = inlined_call_operand.vmem [shape: f32[16,6], index: 7, kind: output, shape index: {}]  }
   0x1 LB: > { %s218_s27 = sshll.u32 %s863_s3, 4  ;;  %s576_s28 = sadd.s32 4294967295, %s675_s24   ;;  %s675_s24 = sphi %s722_s24, %s18_s24   ;;  %s219_s27 = int_to_ptr.hbm [resolvable:$true] %s218_s27 }
   0x2   : > { %p578_p0 = scmp.ge.s32.totalorder %s675_s24, 1  ;;  %p201_p1 = scmp.lt.s32.totalorder %s675_s24, 3 }
   0x3   : > { %p602_p2 = scmp.eq.s32.totalorder %s576_s28, 0  ;;  %s677_s29 = smov [#allocation2]  }
   0x4   : > { %p202_p3 = pnand %p578_p0, %p201_p1  ;;  %s220_s30 = sshll.u32 %s677_s29, 4  ;;  %s221_s30 = int_to_ptr.vmem [resolvable:$true] %s220_s30 }
   0x5   : > { %s678_s8 = smov 512   ;;  %s679_s9 = smov 32  }
   0x6   : > { %p598_p4 = pneg %p202_p3  ;;  %252 = sbr.rel (%p202_p3) target bundleno = 819 (0x333), region = 48 }
   0x8   : > { %p599_p5 = pnand %p602_p2, %p598_p4 }
   0xa   : > { %601 = dma.hbm_to_vmem [thread:$0]  (!%p599_p5), %s219_s27, 8192, %s221_s30, [#allocation3], %s678_s8, %s678_s8, %s679_s9  }
   0xb   : > { %670 = dma.done.wait (%p602_p2), [#allocation3], 8192  }
   0xc   : > { %672 = vsyncadd (%p602_p2), [#allocation3], 4294959104  ;;  %p283_p6 = scmp.lt.s32.totalorder %s576_s28, 1  ;;  %v680_v0 = vmov 0   ;;  %v305_v2 = vld [vmem:[%s861_s1 + $0x28] sm:$0xff]  ;;  %v304_v3 = vld [vmem:[%s861_s1 + $0x20] sm:$0xff]  ;;  %v292_v14 = vlaneseq }
   0xd   : > { %617 = vset.pattern.permute.xlu0 %v680_v0  ;;  %320 = vmatpush.msra.mxu0 %v305_v2  ;;  %v303_v4 = vld [vmem:[%s861_s1 + $0x18] sm:$0xff]  ;;  %v302_v5 = vld [vmem:[%s861_s1 + $0x10] sm:$0xff]  ;;  %v301_v6 = vld [vmem:[%s861_s1 + $0x8] sm:$0xff]  ;;  %vm306_vm0 = vcmask 392192   ;;  %v681_v17 = vmov 0.0   ;;  %vm350_vm2 = vcmask 261120  }
   0xe   : > { %s869_s28 = smov (!%p283_p6, %s576_s28), 1  ;;  %v300_v7 = vld [vmem:[%s861_s1] sm:$0xff]  ;;  %v341_v9 = vld [vmem:[%s862_s2 + $0x78] sm:$0xff]  ;;  %v293_v15 = vand.u32 127, %v292_v14  ;;  %v340_v21 = vld [vmem:[%s862_s2 + $0x70] sm:$0xff]  ;;  %vm497_vm11 = vcmask 48128  }
   0xf   : > { %s583_s10 = sshll.u32 %s869_s28, 3  ;;  %321 = vmatpush.msra.mxu0 %v304_v3  ;;  %v339_v8 = vld [vmem:[%s862_s2 + $0x60] sm:$0xff]  ;;  %406 = vmatpush.msra.mxu3 %v341_v9  ;;  %v338_v11 = vld [vmem:[%s862_s2 + $0x58] sm:$0xff]  ;;  %v337_v22 = vld [vmem:[%s862_s2 + $0x50] sm:$0xff] }
  0x10   : > { %s286_s13 = scalar_lea.vmem %s860_s0, %s583_s10  ;;  %v336_v10 = vld [vmem:[%s862_s2 + $0x40] sm:$0xff]  ;;  %366 = vmatpush.msra.mxu2 %v339_v8  ;;  %v335_v13 = vld [vmem:[%s862_s2 + $0x38] sm:$0xff]  ;;  %v334_v23 = vld [vmem:[%s862_s2 + $0x30] sm:$0xff]  ;;  %s290_s30 = scalar_lea.vmem %s867_s7, %s583_s10 }
  0x11   : > { %v291_v1 = vld [vmem:[%s286_s13] sm:$0xff]  ;;  %322 = vmatpush.msra.mxu0 %v303_v4  ;;  %407 = vmatpush.msra.mxu3 %v338_v11  ;;  %v332_v20 = vld [vmem:[%s862_s2 + $0x18] sm:$0xff]  ;;  %v331_v24 = vld [vmem:[%s862_s2 + $0x10] sm:$0xff] }
  0x12   : > { %295 = vperm.xlu0 %617, %v291_v1   ;;  %v333_v12 = vld [vmem:[%s862_s2 + $0x20] sm:$0xff]  ;;  %367 = vmatpush.msra.mxu2 %v336_v10  ;;  %v472_v26 = vld [vmem:[%s865_s5 + $0x78] sm:$0xff]  ;;  %v471_v27 = vld [vmem:[%s865_s5 + $0x70] sm:$0xff] }
  0x13   : > { %323 = vmatpush.msra.mxu0 %v302_v5  ;;  %408 = vmatpush.msra.mxu3 %v335_v13  ;;  %v330_v19 = vld [vmem:[%s862_s2] sm:$0xff]  ;;  %v470_v28 = vld [vmem:[%s865_s5 + $0x68] sm:$0xff]  ;;  %v468_v30 = vld [vmem:[%s865_s5 + $0x58] sm:$0xff] }
  0x14   : > { %368 = vmatpush.msra.mxu2 %v333_v12  ;;  %473 = vmatpush.msra.mxu1 %v472_v26  ;;  %v469_v29 = vld [vmem:[%s865_s5 + $0x60] sm:$0xff]  ;;  %v467_v31 = vld [vmem:[%s865_s5 + $0x50] sm:$0xff]  ;;  %v466_v32 = vld [vmem:[%s865_s5 + $0x48] sm:$0xff] }
  0x15   : > { %324 = vmatpush.msra.mxu0 %v301_v6  ;;  %409 = vmatpush.msra.mxu3 %v332_v20  ;;  %v465_v33 = vld [vmem:[%s865_s5 + $0x40] sm:$0xff]  ;;  %v464_v35 = vld [vmem:[%s865_s5 + $0x38] sm:$0xff]  ;;  %v463_v36 = vld [vmem:[%s865_s5 + $0x30] sm:$0xff] }
  0x16   : > { %369 = vmatpush.msra.mxu2 %v330_v19  ;;  %474 = vmatpush.msra.mxu1 %v471_v27  ;;  %v342_v34 = vld [vmem:[%s864_s4] sm:$0xf]  ;;  %v462_v38 = vld [vmem:[%s865_s5 + $0x28] sm:$0xff]  ;;  %v460_v41 = vld [vmem:[%s865_s5 + $0x18] sm:$0xff] }
  0x17   : > { %325 = vmatpush.msra.mxu0 %v300_v7  ;;  %v344_v37 = vperm.slane %v342_v34, 0  ;;  %v461_v39 = vld [vmem:[%s865_s5 + $0x20] sm:$0xff]  ;;  %v459_v43 = vld [vmem:[%s865_s5 + $0x10] sm:$0xff]  ;;  %v458_v45 = vld [vmem:[%s865_s5 + $0x8] sm:$0xff]  ;;  %v345_v46 = vperm.slane %v342_v34, 2  ;;  %v346_v53 = vperm.slane %v342_v34, 3 }
  0x18   : > { %386 = vmatpush.msrb.mxu2 %v340_v21  ;;  %475 = vmatpush.msra.mxu1 %v470_v28  ;;  %v457_v47 = vld [vmem:[%s865_s5] sm:$0xff] }
  0x1a   : > { %387 = vmatpush.msrb.mxu2 %v337_v22  ;;  %476 = vmatpush.msra.mxu1 %v469_v29 }
  0x1c   : > { %388 = vmatpush.msrb.mxu2 %v334_v23  ;;  %477 = vmatpush.msra.mxu1 %v468_v30 }
  0x1e   : > { %389 = vmatpush.msrb.mxu2 %v331_v24  ;;  %478 = vmatpush.msra.mxu1 %v467_v31 }
  0x20   : > { %479 = vmatpush.msra.mxu1 %v466_v32 }
  0x22   : > { %480 = vmatpush.msra.mxu1 %v465_v33 }
  0x24   : > { %481 = vmatpush.msra.mxu1 %v464_v35 }
  0x26   : > { %482 = vmatpush.msra.mxu1 %v463_v36 }
  0x28   : > { %483 = vmatpush.msra.mxu1 %v462_v38 }
  0x2a   : > { %484 = vmatpush.msra.mxu1 %v461_v39 }
  0x2c   : > { %485 = vmatpush.msra.mxu1 %v460_v41 }
  0x2e   : > { %486 = vmatpush.msra.mxu1 %v459_v43 }
  0x30   : > { %487 = vmatpush.msra.mxu1 %v458_v45 }
  0x32   : > { %488 = vmatpush.msra.mxu1 %v457_v47 }
  0x84   : > { %v296_v16 = vpop.permute.xlu0 %295 }
  0x85   : > { %vm297_vm1 = vcmp.eq.s32.totalorder %v296_v16, %v293_v15 }
  0x86   : > { %v585_v18 = vsel %vm297_vm1, 1.0, %v681_v17 }
  0x87   : > { %586 = vmatmul.msk.f32.vlgmr.msra.gmra.mxu0 %vm306_vm0, %v585_v18  ;;  %v618_v18 = vld [vmem:[%s866_s6] ss:$0 sm:$0xff] }
 0x104   : > { %v327_v25 = vpop.f32.mrf.mxu0 }
 0x105   : > { %587 = vmatmul.msk.f32.vlgmr.msra.gmra.mxu2 %vm350_vm2, %v327_v25  ;;  %589 = vmatmul.msk.f32.vlgmr.msra.gmra.mxu3 %vm350_vm2, %v327_v25 }
 0x10d   : > { %588 = vmatmul.msk.f32.vlgmr.msrb.gmra.mxu2 %vm350_vm2, %v327_v25 }
 0x188   : > { %v371_v40 = vpop.f32.mrf.mxu2  ;;  %v411_v54 = vpop.f32.mrf.mxu3 }
 0x189   : > { %v372_v42 = vadd.f32 %v371_v40, %v344_v37  ;;  %v412_v57 = vadd.f32 %v411_v54, %v346_v53 }
 0x18b   : > { %v590_v44 = vmul.f32 -1.442695, %v372_v42 }
 0x18d   : > { %619 = vpow2.f32 %v590_v44 }
 0x190   : > { %v391_v48 = vpop.f32.mrf.mxu2 }
 0x191   : > { %v392_v49 = vadd.f32 %v391_v48, %v345_v46 }
 0x193   : > { %v620_v50 = vpop.eup %619  ;;  %v591_v51 = vmul.f32 -1.442695, %v392_v49 }
 0x194   : > { %v420_v52 = vadd.f32 1.0, %v620_v50 }
 0x195   : > { %621 = vpow2.f32 %v591_v51 }
 0x196   : > { %623 = vrcp.f32 %v420_v52  ;;  %v433_v61 = vand.u32 2147483648, %v420_v52  ;;  %v431_v63 = vand.u32 2147483647, %v420_v52  ;;  %vm427_vm4 = vweird.f32 %v420_v52 }
 0x198   : > { %v434_v2 = vor.u32 1.1754944e-38, %v433_v61  ;;  %vm432_vm6 = vcmp.eq.f32.partialorder %v431_v63, 8.507059e+37 }
 0x19b   : > { %v622_v55 = vpop.eup %621 }
 0x19c   : > { %v624_v56 = vpop.eup %623  ;;  %v421_v58 = vadd.f32 1.0, %v622_v55 }
 0x19d   : > { %v423_v59 = vmul.f32 %v624_v56, %v420_v52  ;;  %vm428_vm3 = vweird.f32 %v624_v56 }
 0x19e   : > { %625 = vrcp.f32 %v421_v58  ;;  %vm429_vm5 = vmor %vm427_vm4, %vm428_vm3  ;;  %v448_v9 = vand.u32 2147483648, %v421_v58  ;;  %v446_v11 = vand.u32 2147483647, %v421_v58  ;;  %vm442_vm8 = vweird.f32 %v421_v58 }
 0x19f   : > { %v424_v60 = vsub.f32 1.0, %v423_v59  ;;  %627 = vtanh.f32 %v412_v57 }
 0x1a0   : > { %v449_v13 = vor.u32 1.1754944e-38, %v448_v9  ;;  %vm447_vm10 = vcmp.eq.f32.partialorder %v446_v11, 8.507059e+37 }
 0x1a1   : > { %v425_v62 = vmul.f32 %v624_v56, %v424_v60 }
 0x1a3   : > { %v426_v0 = vadd.f32 %v624_v56, %v425_v62 }
 0x1a4   : > { %v626_v1 = vpop.eup %625 }
 0x1a5   : > { %v430_v3 = vsel %vm429_vm5, %v624_v56, %v426_v0  ;;  %v438_v4 = vmul.f32 %v626_v1, %v421_v58  ;;  %v628_v5 = vpop.eup %627  ;;  %vm443_vm7 = vweird.f32 %v626_v1 }
 0x1a6   : > { %v435_v6 = vsel %vm432_vm6, %v434_v2, %v430_v3  ;;  %vm444_vm9 = vmor %vm442_vm8, %vm443_vm7 }
 0x1a7   : > { %v453_v7 = vmul.f32 %v628_v5, %v435_v6  ;;  %v439_v8 = vsub.f32 1.0, %v438_v4 }
 0x1a9   : > { %v440_v10 = vmul.f32 %v626_v1, %v439_v8  ;;  %629 = vtanh.f32 %v453_v7 }
 0x1ab   : > { %v441_v12 = vadd.f32 %v626_v1, %v440_v10 }
 0x1ad   : > { %v445_v14 = vsel %vm444_vm9, %v626_v1, %v441_v12 }
 0x1ae   : > { %v450_v15 = vsel %vm447_vm10, %v449_v13, %v445_v14 }
 0x1af   : > { %v630_v16 = vpop.eup %629 }
 0x1b0   : > { %v455_v17 = vmul.f32 %v630_v16, %v450_v15 }
 0x1b2   : > { %489 = vmatmul.f32.vlgmr.msra.gmra.mxu1 %v455_v17 }
 0x22f   : > { %v490_v19 = vpop.f32.mrf.mxu1 }
 0x230   : > { %v496_v20 = vadd.f32 %v618_v18, %v490_v19 }
 0x232   : > { %v498_v21 = vsel %vm497_vm11, %v496_v20, -inf }
 0x233   : > { %499 = vmax.xlane.f32.xlu0 %v498_v21 }
 0x2a6   : > { %v500_v22 = vpop.xlane.xlu0 %499 }
 0x2a7   : > { %v501_v23 = vsub.f32 %v496_v20, %v500_v22 }
 0x2a9   : > { %v502_v24 = vmul.f32 1.442695, %v501_v23 }
 0x2ab   : > { %631 = vpow2.f32 %v502_v24 }
 0x2b1   : > { %v632_v25 = vpop.eup %631 }
 0x2b2   : > { %v504_v26 = vsel %vm497_vm11, %v632_v25, 0.0 }
 0x2b3   : > { %505 = vadd.xlane.f32.xlu1 %v504_v26 }
 0x326   : > { %v506_v27 = vpop.xlane.xlu1 %505 }
 0x327   : > { %633 = vlog2.f32 %v506_v27 }
 0x32d   : > { %v634_v28 = vpop.eup %633 }
 0x32e   : > { %v508_v29 = vmul.f32 0.6931472, %v634_v28 }
 0x330   : > { %v509_v30 = vsub.f32 %v501_v23, %v508_v29 }
 0x332   : > { %510 = vst.msk [vmem:[%s290_s30] sm:$0xff] %vm497_vm11, %v509_v30 }
 0x333 PF: > { %s18_s24 = sadd.s32 1, %s675_s24  }
 0x334   : > { %p15_p7 = scmp.ge.s32.totalorder %s18_s24, 4  }
 0x336   :  { %17 = sbr.rel (!%p15_p7) target bundleno = 1 (0x1), region = 83 }
 0x33b   :  { %530 = vsyncpa [#allocation3], 1 }
 0x33c   :  { %532 = vsyncpa [#allocation3 + $0x1], 1 }

</bundles_post_ra>
